<compile_context>
chip_gen: v5e
topology: v5e:2x2
jax: 0.10.0
libtpu: 0.0.40
codegen_flags: <defaults>
</compile_context>

<pallas_src>
import jax
import jax.numpy as jnp
from jax.experimental import pallas as pl
from jax.experimental.pallas import tpu as pltpu


def _round_up(x, m):
    return ((x + m - 1) // m) * m


def _cdiv(a, b):
    return (a + b - 1) // b


def _centering_matrix(state_dim, space_dim, dtype=jnp.float32):
    """C such that (x @ C) == SubtractMeanPos(x).

    Position column j (< x_sz) belongs to spatial coordinate j % space_dim; its
    centered value is x[:, j] - mean over all position columns with the same
    coordinate.  Velocity columns pass through unchanged.  That is the linear
    map  C[i, j] = delta_ij - [i, j both positions & same coord] / n_particles.
    """
    x_sz = state_dim // 2
    n_part = x_sz // space_dim
    idx = jnp.arange(state_dim)
    is_pos = idx < x_sz
    coord = idx % space_dim
    same = (coord[:, None] == coord[None, :]) & is_pos[:, None] & is_pos[None, :]
    return jnp.eye(state_dim, dtype=dtype) - same.astype(dtype) / n_part


def _enc_condition_kernel(x_ref, w_ref, b_ref, o_ref):
    # Centering already folded into W; kernel is pure MXU matmul + bias add.
    w = w_ref[...]
    x = x_ref[...].astype(w.dtype)  # cast only at the dot (bf16-W path)
    y = jnp.dot(x, w, preferred_element_type=jnp.float32)
    o_ref[...] = (y + b_ref[...]).astype(o_ref.dtype)


def enc_condition(x, w, b, *, space_dim=1, use_bf16_mxu=False,
                  block_batch=None, force_pallas=False):
    """EncCondition forward.

    x: (batch, state_dim); w: (state_dim, dim_out)  [= PyTorch Linear.weight.T];
    b: (dim_out,).  Returns (batch, dim_out) in x.dtype.
    """
    batch, state_dim = x.shape
    assert state_dim % 2 == 0
    x_sz = state_dim // 2
    assert x_sz % space_dim == 0
    dim_out = w.shape[1]
    out_dtype = x.dtype

    # ---- host-side prep: fold centering into W ------------------------------
    C = _centering_matrix(state_dim, space_dim, dtype=jnp.float32)
    w_folded = C @ w.astype(jnp.float32)                  # (state_dim, dim_out)
    if use_bf16_mxu:
        # Halves the (already tiny) weight DMA; accumulation stays f32.
        w_folded = w_folded.astype(jnp.bfloat16)
    b2 = b.astype(jnp.float32).reshape(1, dim_out)

    x_itemsize = jnp.dtype(x.dtype).itemsize
    out_itemsize = jnp.dtype(out_dtype).itemsize
    w_itemsize = jnp.dtype(w_folded.dtype).itemsize

    # ---- tiny-problem fast path: a fused XLA matmul beats kernel launch -----
    working_set = batch * (state_dim * x_itemsize + dim_out * out_itemsize)
    if not force_pallas and working_set < (2 << 20):
        y = jnp.dot(x.astype(w_folded.dtype), w_folded,
                    preferred_element_type=jnp.float32)
        return (y + b2).astype(out_dtype)

    # ---- batch tiling --------------------------------------------------------
    # Sublane packing: bf16 rows pack 16 per sublane group.
    align = 16 if (x.dtype == jnp.bfloat16 or out_dtype == jnp.bfloat16) else 8

    if block_batch is None:
        vmem_budget = 24 * 1024 * 1024                    # headroom under 32 MiB
        resident = 2 * (state_dim * dim_out * w_itemsize + dim_out * 4)
        bytes_per_row = 2 * (state_dim * x_itemsize + dim_out * out_itemsize)
        tb_cap = max(align, ((vmem_budget - resident) // bytes_per_row)
                     // align * align)
        tb = min(8192, tb_cap, _round_up(batch, align))
        # v7x megacore: keep >= 2 grid steps when the batch is large enough so
        # the "parallel" axis can actually shard across the two TensorCores.
        if batch >= 256:
            tb = min(tb, _round_up(_cdiv(batch, 2), align))
        tb = max(align, (tb // align) * align)
    else:
        tb = block_batch
        assert tb % align == 0, f"block_batch must be a multiple of {align}"

    grid = (_cdiv(batch, tb),)                            # boundary blocks masked

    cost = pl.CostEstimate(
        flops=2 * batch * state_dim * dim_out,
        transcendentals=0,
        bytes_accessed=(batch * state_dim * x_itemsize
                        + batch * dim_out * out_itemsize
                        + state_dim * dim_out * w_itemsize
                        + dim_out * 4),
    )

    return pl.pallas_call(
        _enc_condition_kernel,
        out_shape=jax.ShapeDtypeStruct((batch, dim_out), out_dtype),
        grid=grid,
        in_specs=[
            pl.BlockSpec((tb, state_dim), lambda i: (i, 0)),          # x tile
            pl.BlockSpec((state_dim, dim_out), lambda i: (0, 0)),     # W resident
            pl.BlockSpec((1, dim_out), lambda i: (0, 0)),             # b resident
        ],
        out_specs=pl.BlockSpec((tb, dim_out), lambda i: (i, 0)),
        compiler_params=pltpu.CompilerParams(
            dimension_semantics=("parallel",),    # 2 TCs on v7x; no-op v5e/v6e
            vmem_limit_bytes=32 * 1024 * 1024,
        ),
        cost_estimate=cost,
    )(x, w_folded, b2)


def _reference(x, w, b, *, space_dim=1):
    """Pure-JAX reference mirroring the PyTorch forward (unfolded)."""
    batch, state_dim = x.shape
    x_sz = state_dim // 2
    pos = x[:, :x_sz].reshape(batch, -1, space_dim)
    pos = pos - pos.mean(axis=1, keepdims=True)
    xv = jnp.concatenate([pos.reshape(batch, x_sz), x[:, x_sz:]], axis=1)
    return xv @ w + b


if __name__ == "__main__":
    state_dim = 24
    dim_out = 32
    space_dim = 1

    key = jax.random.PRNGKey(0)
    kx, kw, kb, kx2 = jax.random.split(key, 4)

    bound = 1.0 / (state_dim ** 0.5)
    w = jax.random.uniform(kw, (state_dim, dim_out), jnp.float32, -bound, bound)
    b = jax.random.uniform(kb, (dim_out,), jnp.float32, -bound, bound)

    # --- 1) f32 Pallas path (single grid step), batch = 32 -------------------
    batch = 32
    x = jax.random.normal(kx, (batch, state_dim), dtype=jnp.float32)
    ref = _reference(x, w, b, space_dim=space_dim)
    out = jax.block_until_ready(
        enc_condition(x, w, b, space_dim=space_dim, force_pallas=True))
    assert out.shape == (batch, dim_out)
    assert jnp.allclose(out, ref, atol=1e-4, rtol=1e-4), "f32 mismatch vs reference"

    # --- 2) bf16-W MXU path (looser tolerance) --------------------------------
    out_bf16 = jax.block_until_ready(
        enc_condition(x, w, b, space_dim=space_dim, use_bf16_mxu=True,
                      force_pallas=True))
    assert out_bf16.shape == (batch, dim_out)
    assert jnp.allclose(out_bf16, ref, atol=5e-2, rtol=5e-2), "bf16 mismatch vs reference"

    # --- 3) multi-step grid with a partial boundary block (batch=20, tb=16) --
    batch2 = 20
    x2 = jax.random.normal(kx2, (batch2, state_dim), dtype=jnp.float32)
    ref2 = _reference(x2, w, b, space_dim=space_dim)
    out2 = jax.block_until_ready(
        enc_condition(x2, w, b, space_dim=space_dim, block_batch=16,
                      force_pallas=True))
    assert out2.shape == (batch2, dim_out)
    assert jnp.allclose(out2, ref2, atol=1e-4, rtol=1e-4), "boundary-block mismatch"

    # --- 4) small-problem XLA dispatch path -----------------------------------
    out_small = jax.block_until_ready(
        enc_condition(x, w, b, space_dim=space_dim))      # auto-dispatch (tiny)
    assert jnp.allclose(out_small, ref, atol=1e-4, rtol=1e-4), "XLA fast-path mismatch"

    print("KERNEL_OK")
</pallas_src>

<mosaic_0001>
module attributes {stable_mosaic.version = 11 : i64} {
  func.func @_enc_condition_kernel(%arg0: i32, %arg1: memref<32x24xf32, #tpu.memory_space<vmem>>, %arg2: memref<24x32xf32, #tpu.memory_space<vmem>>, %arg3: memref<1x32xf32, #tpu.memory_space<vmem>>, %arg4: memref<32x32xf32, #tpu.memory_space<vmem>>) attributes {dimension_semantics = [#tpu.dimension_semantics<parallel>], iteration_bounds = array<i64: 1>, scalar_prefetch = 0 : i64, scratch_operands = 0 : i64, tpu.core_type = #tpu.core_type<tc>, window_params = [{transform_indices = @transform_0, window_bounds = array<i64: 32, 24>}, {pipeline_mode = #tpu.pipeline_mode<synchronous>, transform_indices = @transform_1, window_bounds = array<i64: 24, 32>}, {pipeline_mode = #tpu.pipeline_mode<synchronous>, transform_indices = @transform_2, window_bounds = array<i64: 1, 32>}, {transform_indices = @transform_3, window_bounds = array<i64: 32, 32>}]} {
    %c0 = arith.constant 0 : index
    %c0_0 = arith.constant 0 : index
    %0 = vector.load %arg2[%c0, %c0_0] : memref<24x32xf32, #tpu.memory_space<vmem>>, vector<24x32xf32>
    %c0_1 = arith.constant 0 : index
    %c0_2 = arith.constant 0 : index
    %1 = vector.load %arg1[%c0_1, %c0_2] : memref<32x24xf32, #tpu.memory_space<vmem>>, vector<32x24xf32>
    %cst = arith.constant dense<0.000000e+00> : vector<32x32xf32>
    %2 = tpu.matmul %1, %0, %cst {dimension_numbers = #tpu.dot_dimension_numbers<[1], [0], [0], [1], [0, 0, 1, 1], [], []>} : vector<32x24xf32>, vector<24x32xf32>, vector<32x32xf32> -> vector<32x32xf32>
    %c0_3 = arith.constant 0 : index
    %c0_4 = arith.constant 0 : index
    %3 = vector.load %arg3[%c0_3, %c0_4] : memref<1x32xf32, #tpu.memory_space<vmem>>, vector<1x32xf32>
    %4 = vector.broadcast %3 : vector<1x32xf32> to vector<32x32xf32>
    %5 = arith.addf %2, %4 : vector<32x32xf32>
    %c0_5 = arith.constant 0 : index
    %c0_6 = arith.constant 0 : index
    %6 = vector.load %arg4[%c0_5, %c0_6] : memref<32x32xf32, #tpu.memory_space<vmem>>, vector<32x32xf32>
    tpu.vector_store %arg4[%c0_5, %c0_6], %5 {strides = array<i32>} : memref<32x32xf32, #tpu.memory_space<vmem>>, vector<32x32xf32>,
    return
  }
  func.func @transform_0(%arg0: i32) -> (i32, i32) {
    %c0_i32 = arith.constant 0 : i32
    %c0_i32_0 = arith.constant 0 : i32
    return %arg0, %c0_i32 : i32, i32
  }
  func.func @transform_1(%arg0: i32) -> (i32, i32) {
    %c0_i32 = arith.constant 0 : i32
    %c0_i32_0 = arith.constant 0 : i32
    %c0_i32_1 = arith.constant 0 : i32
    return %c0_i32, %c0_i32_0 : i32, i32
  }
  func.func @transform_2(%arg0: i32) -> (i32, i32) {
    %c0_i32 = arith.constant 0 : i32
    %c0_i32_0 = arith.constant 0 : i32
    %c0_i32_1 = arith.constant 0 : i32
    return %c0_i32, %c0_i32_0 : i32, i32
  }
  func.func @transform_3(%arg0: i32) -> (i32, i32) {
    %c0_i32 = arith.constant 0 : i32
    %c0_i32_0 = arith.constant 0 : i32
    return %arg0, %c0_i32 : i32, i32
  }
}

</mosaic_0001>

<bundles_post_ra>
// kernel: tpu_custom_call.1
= control target key start
LH: loop header
LB: loop body
LE: loop exit
PB: predicated region body
PF: predicated region fallthrough
CT: control target
= control target key end

     0   :  { %vm26_vm0 = vcmask 195584   ;;  %s188_s0 = inlined_call_operand.vmem [shape: f32[32,24], index: 0, kind: input, shape index: {}]   ;;  %s189_s1 = inlined_call_operand.vmem [shape: f32[24,32], index: 1, kind: input, shape index: {}]   ;;  %s190_s2 = inlined_call_operand.vmem [shape: f32[1,32], index: 2, kind: input, shape index: {}]   ;;  %s191_s3 = inlined_call_operand.hbm [shape: f32[32,32], index: 3, kind: output, shape index: {}]  }
   0x1   :  { %v17_v0 = vld [vmem:[%s189_s1 + $0x10] sm:$0xff]  ;;  %v16_v1 = vld [vmem:[%s189_s1 + $0x8] sm:$0xff]  ;;  %v15_v2 = vld [vmem:[%s189_s1] sm:$0xff] }
   0x2   :  { %96 = vmatpush.msra.mxu2 %v17_v0  ;;  %97 = vmatpush.msra.mxu3 %v17_v0  ;;  %v20_v3 = vld [vmem:[%s188_s0 + $0x10] sm:$0xff]  ;;  %v21_v4 = vld [vmem:[%s188_s0 + $0x18] sm:$0xff] }
   0x3   :  { %52 = vmatpush.msra.mxu0 %v17_v0  ;;  %95 = vmatpush.msra.mxu1 %v17_v0 }
   0x4   :  { %99 = vmatpush.msra.mxu2 %v16_v1  ;;  %100 = vmatpush.msra.mxu3 %v16_v1 }
   0x5   :  { %8 = vsyncpa [#allocation3], 0  ;;  %53 = vmatpush.msra.mxu0 %v16_v1  ;;  %98 = vmatpush.msra.mxu1 %v16_v1  ;;  %v18_v5 = vld [vmem:[%s188_s0] sm:$0xff]  ;;  %v19_v6 = vld [vmem:[%s188_s0 + $0x8] sm:$0xff]  ;;  %vm68_vm1 = vcmask 261120   ;;  %s134_s27 = smov [#allocation2]  }
   0x6   :  { %102 = vmatpush.msra.mxu2 %v15_v2  ;;  %103 = vmatpush.msra.mxu3 %v15_v2  ;;  %v107_v7 = vld [vmem:[%s190_s2] ss:$0 sm:$0xff]  ;;  %s77_s28 = sshll.u32 %s134_s27, 4  ;;  %s79_s0 = sshll.u32 %s191_s3, 4  ;;  %s78_s28 = int_to_ptr.vmem [resolvable:$true] %s77_s28  ;;  %s80_s0 = int_to_ptr.hbm [resolvable:$true] %s79_s0 }
   0x7   :  { %93 = vmatmul.msk.f32.vlgmr.msra.gmra.mxu2 %vm26_vm0, %v20_v3  ;;  %94 = vmatmul.msk.f32.vlgmr.msra.gmra.mxu3 %vm26_vm0, %v21_v4  ;;  %s135_s2 = smov 128   ;;  %s136_s4 = smov 8  }
   0x8   :  { %54 = vmatpush.msra.mxu0 %v15_v2  ;;  %101 = vmatpush.msra.mxu1 %v15_v2 }
   0x9   :  { %91 = vmatmul.msk.f32.vlgmr.msra.gmra.mxu0 %vm26_vm0, %v18_v5  ;;  %92 = vmatmul.msk.f32.vlgmr.msra.gmra.mxu1 %vm26_vm0, %v19_v6 }
  0x86   :  { %v56_v8 = vpop.f32.mrf.mxu0  ;;  %v59_v9 = vpop.f32.mrf.mxu1 }
  0x87   :  { %v57_v10 = vadd.f32 %v107_v7, %v56_v8  ;;  %v60_v11 = vadd.f32 %v107_v7, %v59_v9 }
  0x89   :  { %69 = vst.msk [vmem:[#allocation2] sm:$0xff] %vm68_vm1, %v57_v10 }
  0x8a   :  { %70 = vst.msk [vmem:[#allocation2 + $0x8] sm:$0xff] %vm68_vm1, %v60_v11  ;;  %v62_v12 = vpop.f32.mrf.mxu2  ;;  %v65_v13 = vpop.f32.mrf.mxu3 }
  0x8b   :  { %v63_v14 = vadd.f32 %v107_v7, %v62_v12  ;;  %v66_v15 = vadd.f32 %v107_v7, %v65_v13 }
  0x8d   :  { %71 = vst.msk [vmem:[#allocation2 + $0x10] sm:$0xff] %vm68_vm1, %v63_v14 }
  0x8e   :  { %72 = vst.msk [vmem:[#allocation2 + $0x18] sm:$0xff] %vm68_vm1, %v66_v15 }
  0x8f   :  { %85 = dma.vmem_to_hbm [thread:$0]  %s78_s28, 512, %s80_s0, [#allocation3], %s135_s2, %s135_s2, %s136_s4  }
  0x90   :  { %132 = dma.done.wait [#allocation3], 512  }
  0x91   :  { %133 = vsyncadd [#allocation3], 4294966784 }
  0x92   :  { %90 = vsyncpa [#allocation3], 1 }

</bundles_post_ra>
